<compile_context>
chip_gen: v7x
topology: tpu7x:2x2x1
jax: 0.10.0
libtpu: 0.0.40
codegen_flags: <defaults>
</compile_context>

<pallas_src>
import jax
import jax.numpy as jnp
from jax.experimental import pallas as pl
from jax.experimental.pallas import tpu as pltpu


def _round_up(x, m):
    return (x + m - 1) // m * m


# ----------------------------------------------------------------------------
# Kernels
# ----------------------------------------------------------------------------
def _patch_proj_kernel_single_k(p_ref, w_ref, b_ref, o_ref):
    # p_ref: [TM, K]  (bf16)   w_ref: [K, Np] (bf16, resident across the grid)
    # b_ref: [1,  Np] (f32)    o_ref: [TM, Np] (output dtype)
    acc = jnp.dot(p_ref[...], w_ref[...], preferred_element_type=jnp.float32)
    o_ref[...] = (acc + b_ref[...]).astype(o_ref.dtype)


def _patch_proj_kernel_tiled_k(p_ref, w_ref, b_ref, o_ref, acc_ref):
    # Fallback for very large K.  acc_ref persists across the K grid axis.
    k = pl.program_id(1)

    @pl.when(k == 0)
    def _init():
        # Fold the bias into the accumulator init (no separate finalize add).
        acc_ref[...] = jnp.broadcast_to(b_ref[...], acc_ref.shape)

    acc_ref[...] += jnp.dot(p_ref[...], w_ref[...],
                            preferred_element_type=jnp.float32)

    @pl.when(k == pl.num_programs(1) - 1)
    def _finalize():
        o_ref[...] = acc_ref[...].astype(o_ref.dtype)


# ----------------------------------------------------------------------------
# Tiling heuristics
# ----------------------------------------------------------------------------
_VMEM_BUDGET = 28 * 1024 * 1024  # conservative working-set target (fits v7x)


def _pick_tiles(M, K, N, comp_bytes, out_bytes):
    """Lane-dense N; single K tile for all realistic ViT K; TM as large as the
    VMEM budget allows (multiple of 16 for bf16 packing)."""
    n_pad = _round_up(N, 128)
    k128 = _round_up(K, 128)

    single_k = k128 <= 4096          # covers K = C*ph*pw for every standard ViT
    if single_k:
        tk, k_pad = k128, k128
    else:
        # Pick a tk that divides round_up(K,128) exactly (no zero-pad FLOPs);
        # prefer multiples of 256 for the v6e/v7x MXU cadence.
        tk = 128
        for cand in (1024, 768, 512, 256):
            if k128 % cand == 0:
                tk = cand
                break
        k_pad = k128

    def working_set(tm_):
        w_bytes = (k_pad if single_k else tk) * n_pad * comp_bytes
        acc = 0 if single_k else tm_ * n_pad * 4
        return (2 * tm_ * tk * comp_bytes        # patches (double buffered)
                + 2 * w_bytes                    # weight
                + 2 * tm_ * n_pad * out_bytes    # output (double buffered)
                + acc)

    tm = 1024
    while tm > 128 and working_set(tm) > _VMEM_BUDGET:
        tm //= 2
    tm = min(tm, _round_up(M, 16))

    # v7x megacore: prefer an even number of M tiles so both TCs stay busy.
    grid_m = -(-M // tm)
    if grid_m > 1 and grid_m % 2 == 1:
        tm2 = _round_up(-(-M // (grid_m + 1)), 16)
        if tm2 >= 128 and (-(-M // tm2)) % 2 == 0 and working_set(tm2) <= _VMEM_BUDGET:
            tm = tm2

    return tm, tk, k_pad, n_pad, single_k


# ----------------------------------------------------------------------------
# Forward
# ----------------------------------------------------------------------------
def patch_embedding_forward(x, weight, bias, patch_size,
                            compute_dtype=jnp.bfloat16):
    """ViT PatchEmbedding forward (norm_layer=None -> Identity).

    x:      [B, C, H, W]            (PyTorch NCHW)
    weight: [embed_dim, C, ph, pw]  (PyTorch Conv2d OIHW)
    bias:   [embed_dim]
    Returns [B, num_patches, embed_dim] in x.dtype.
    """
    B, C, H, W = x.shape
    ph, pw = patch_size
    assert H % ph == 0 and W % pw == 0
    gh, gw = H // ph, W // pw
    num_patches = gh * gw
    N = weight.shape[0]               # embed_dim
    K = C * ph * pw
    M = B * num_patches

    comp_bytes = jnp.dtype(compute_dtype).itemsize
    out_bytes = jnp.dtype(x.dtype).itemsize
    tm, tk, k_pad, n_pad, single_k = _pick_tiles(M, K, N, comp_bytes, out_bytes)

    # --- glue: non-overlapping patch extraction (pure reshape/transpose).
    # TODO(synk): verify (HLO/xprof) that allow_input_fusion folds this
    # reshape/transpose/cast/pad into the kernel's input DMA instead of
    # materializing an [M, k_pad] bf16 copy in HBM.
    patches = x.reshape(B, C, gh, ph, gw, pw)
    patches = patches.transpose(0, 2, 4, 1, 3, 5).reshape(M, K)
    patches = patches.astype(compute_dtype)
    if k_pad != K:
        patches = jnp.pad(patches, ((0, 0), (0, k_pad - K)))

    # Conv2d (kernel==stride) == matmul vs weight flattened over (C, ph, pw),
    # same ordering as the patch flatten above.
    w_mat = weight.reshape(N, K).T.astype(compute_dtype)           # [K, N]
    if k_pad != K or n_pad != N:
        w_mat = jnp.pad(w_mat, ((0, k_pad - K), (0, n_pad - N)))
    b_mat = bias.astype(jnp.float32).reshape(1, N)
    if n_pad != N:
        b_mat = jnp.pad(b_mat, ((0, 0), (0, n_pad - N)))

    grid_m = pl.cdiv(M, tm)

    if single_k:
        grid = (grid_m,)
        kernel = _patch_proj_kernel_single_k
        in_specs = [
            pl.BlockSpec((tm, tk), lambda i: (i, 0)),        # patches (streamed)
            pl.BlockSpec((tk, n_pad), lambda i: (0, 0)),     # weight (resident)
            pl.BlockSpec((1, n_pad), lambda i: (0, 0)),      # bias   (resident)
        ]
        out_specs = pl.BlockSpec((tm, n_pad), lambda i: (i, 0))
        scratch_shapes = []
        dim_sem = ("parallel",)
        weight_fetches = 1
    else:
        # Rare large-K fallback (note: weight tile is re-fetched per M tile).
        grid = (grid_m, k_pad // tk)
        kernel = _patch_proj_kernel_tiled_k
        in_specs = [
            pl.BlockSpec((tm, tk), lambda i, k: (i, k)),
            pl.BlockSpec((tk, n_pad), lambda i, k: (k, 0)),
            pl.BlockSpec((1, n_pad), lambda i, k: (0, 0)),
        ]
        out_specs = pl.BlockSpec((tm, n_pad), lambda i, k: (i, 0))
        scratch_shapes = [pltpu.VMEM((tm, n_pad), jnp.float32)]
        dim_sem = ("parallel", "arbitrary")
        weight_fetches = grid_m

    cost = pl.CostEstimate(
        flops=2 * M * k_pad * n_pad,
        transcendentals=0,
        bytes_accessed=(M * k_pad * comp_bytes                       # patches
                        + weight_fetches * k_pad * n_pad * comp_bytes  # weight
                        + M * n_pad * out_bytes                      # output
                        + n_pad * 4))                                # bias

    out = pl.pallas_call(
        kernel,
        out_shape=jax.ShapeDtypeStruct((M, n_pad), x.dtype),
        grid_spec=pltpu.PrefetchScalarGridSpec(
            num_scalar_prefetch=0,
            grid=grid,
            in_specs=in_specs,
            out_specs=out_specs,
            scratch_shapes=scratch_shapes,
        ),
        compiler_params=pltpu.CompilerParams(
            dimension_semantics=dim_sem,
            vmem_limit_bytes=48 * 1024 * 1024,
            allow_input_fusion=[True, False, False],
        ),
        cost_estimate=cost,
    )(patches, w_mat, b_mat)

    if n_pad != N:
        out = out[:, :N]
    return out.reshape(B, num_patches, N)


if __name__ == "__main__":
    # Small shapes consistent with the module:
    # img_size=16, patch_size=4, in_channel=4, embed_dim=32
    B, C, H, W = 2, 4, 16, 16
    ph = pw = 4
    embed_dim = 32

    key = jax.random.PRNGKey(0)
    kx, kw, kb = jax.random.split(key, 3)
    x = jax.random.normal(kx, (B, C, H, W), dtype=jnp.float32)
    weight = jax.random.normal(kw, (embed_dim, C, ph, pw), dtype=jnp.float32) * 0.02
    bias = jax.random.normal(kb, (embed_dim,), dtype=jnp.float32) * 0.02

    fwd = jax.jit(patch_embedding_forward, static_argnums=(3,))
    out = fwd(x, weight, bias, (ph, pw))
    out = jax.block_until_ready(out)

    # Reference in plain JAX (f32): Conv2d with stride == kernel size.
    ref = jax.lax.conv_general_dilated(
        x, weight, window_strides=(ph, pw), padding="VALID",
        dimension_numbers=("NCHW", "OIHW", "NCHW"))
    ref = (ref + bias[None, :, None, None]).reshape(B, embed_dim, -1)
    ref = jnp.transpose(ref, (0, 2, 1))

    assert out.shape == (B, (H // ph) * (W // pw), embed_dim)
    # bf16 operands with f32 accumulation -> compare at bf16-level tolerance.
    assert jnp.allclose(out, ref, atol=1e-2, rtol=1e-2)

    print("KERNEL_OK")
</pallas_src>

<mosaic_0001>
module attributes {stable_mosaic.version = 11 : i64} {
  func.func @_patch_proj_kernel_single_k(%arg0: i32, %arg1: memref<32x128xbf16, #tpu.memory_space<vmem>>, %arg2: memref<128x128xbf16, #tpu.memory_space<vmem>>, %arg3: memref<1x128xf32, #tpu.memory_space<vmem>>, %arg4: memref<32x128xf32, #tpu.memory_space<vmem>>) attributes {dimension_semantics = [#tpu.dimension_semantics<parallel>], iteration_bounds = array<i64: 1>, scalar_prefetch = 0 : i64, scratch_operands = 0 : i64, tpu.core_type = #tpu.core_type<tc>, window_params = [{transform_indices = @transform_0, window_bounds = array<i64: 32, 128>}, {pipeline_mode = #tpu.pipeline_mode<synchronous>, transform_indices = @transform_1, window_bounds = array<i64: 128, 128>}, {pipeline_mode = #tpu.pipeline_mode<synchronous>, transform_indices = @transform_2, window_bounds = array<i64: 1, 128>}, {transform_indices = @transform_3, window_bounds = array<i64: 32, 128>}]} {
    %c0 = arith.constant 0 : index
    %c0_0 = arith.constant 0 : index
    %0 = vector.load %arg1[%c0, %c0_0] : memref<32x128xbf16, #tpu.memory_space<vmem>>, vector<32x128xbf16>
    %c0_1 = arith.constant 0 : index
    %c0_2 = arith.constant 0 : index
    %1 = vector.load %arg2[%c0_1, %c0_2] : memref<128x128xbf16, #tpu.memory_space<vmem>>, vector<128x128xbf16>
    %cst = arith.constant dense<0.000000e+00> : vector<32x128xf32>
    %2 = tpu.matmul %0, %1, %cst {dimension_numbers = #tpu.dot_dimension_numbers<[1], [0], [0], [1], [0, 0, 1, 1], [], []>} : vector<32x128xbf16>, vector<128x128xbf16>, vector<32x128xf32> -> vector<32x128xf32>
    %c0_3 = arith.constant 0 : index
    %c0_4 = arith.constant 0 : index
    %3 = vector.load %arg3[%c0_3, %c0_4] : memref<1x128xf32, #tpu.memory_space<vmem>>, vector<1x128xf32>
    %4 = vector.broadcast %3 : vector<1x128xf32> to vector<32x128xf32>
    %5 = arith.addf %2, %4 : vector<32x128xf32>
    %c0_5 = arith.constant 0 : index
    %c0_6 = arith.constant 0 : index
    %6 = vector.load %arg4[%c0_5, %c0_6] : memref<32x128xf32, #tpu.memory_space<vmem>>, vector<32x128xf32>
    tpu.vector_store %arg4[%c0_5, %c0_6], %5 {strides = array<i32>} : memref<32x128xf32, #tpu.memory_space<vmem>>, vector<32x128xf32>,
    return
  }
  func.func @transform_0(%arg0: i32) -> (i32, i32) {
    %c0_i32 = arith.constant 0 : i32
    %c0_i32_0 = arith.constant 0 : i32
    return %arg0, %c0_i32 : i32, i32
  }
  func.func @transform_1(%arg0: i32) -> (i32, i32) {
    %c0_i32 = arith.constant 0 : i32
    %c0_i32_0 = arith.constant 0 : i32
    %c0_i32_1 = arith.constant 0 : i32
    return %c0_i32, %c0_i32_0 : i32, i32
  }
  func.func @transform_2(%arg0: i32) -> (i32, i32) {
    %c0_i32 = arith.constant 0 : i32
    %c0_i32_0 = arith.constant 0 : i32
    %c0_i32_1 = arith.constant 0 : i32
    return %c0_i32, %c0_i32_0 : i32, i32
  }
  func.func @transform_3(%arg0: i32) -> (i32, i32) {
    %c0_i32 = arith.constant 0 : i32
    %c0_i32_0 = arith.constant 0 : i32
    return %arg0, %c0_i32 : i32, i32
  }
}

</mosaic_0001>

<bundles_post_ra>
// kernel: patch_embedding_forward.2
= control target key start
LH: loop header
LB: loop body
LE: loop exit
PB: predicated region body
PF: predicated region fallthrough
CT: control target
= control target key end

     0   :  { %s423_s0 = inlined_call_operand.vmem [shape: bf16[128,128], index: 0, kind: input, shape index: {}]   ;;  %s424_s1 = inlined_call_operand.vmem [shape: f32[1,128], index: 1, kind: input, shape index: {}]   ;;  %s425_s2 = inlined_call_operand.vmem [shape: bf16[32,64], index: 2, kind: input, shape index: {}]   ;;  %s426_s3 = inlined_call_operand.<no memory space> [shape: bf16[], index: 3, kind: input, shape index: {}]   ;;  %s427_s4 = inlined_call_operand.hbm [shape: f32[32,128], index: 4, kind: output, shape index: {}]  }
   0x1   :  { %v9_v0 = vstv %s426_s3 }
   0x2   :  { %v10_v1 = vunpack.i.l.bf16 %v9_v0 }
   0x3   :  { %v312_v2 = vld [vmem:[%s423_s0] sm:$0xff]   ;;  %v33_v3 = vlaneseq  ;;  %v313_v4 = vld [vmem:[%s423_s0 + $0x8] sm:$0xff]   ;;  %v314_v5 = vld [vmem:[%s423_s0 + $0x10] sm:$0xff]  }
   0x4   :  { %288 = vmatprep.subr.bf16.mxu0 %v312_v2  ;;  %v315_v7 = vld [vmem:[%s423_s0 + $0x18] sm:$0xff]   ;;  %v30_v8 = vld [vmem:[%s425_s2] sm:$0xff]   ;;  %v265_v9 = vld [vmem:[%s425_s2 + $0x8] sm:$0xff]  }
   0x5   :  { %289 = vmatpush3.bf16.msra.mxu0 %v312_v2  ;;  %v34_v6 = vand.u32 127, %v33_v3 }
   0x6   :  { %290 = vmatprep.subr.bf16.mxu0 %v313_v4 }
   0x7   :  { %vm36_vm0 = vcmp.lt.s32.totalorder %v34_v6, 64 }
   0x9   :  { %291 = vmatpush3.bf16.msra.mxu0 %v313_v4 }
   0xa   :  { %292 = vmatprep.subr.bf16.mxu0 %v314_v5 }
   0xb   :  { %14 = vsyncpa [#allocation8], 0  ;;  %v31_v10 = vunpack.c.l.bf16 %v30_v8  ;;  %v52_v11 = vunpack.c.h.bf16 %v30_v8  ;;  %v74_v12 = vunpack.c.l.bf16 %v265_v9  ;;  %v96_v13 = vunpack.c.h.bf16 %v265_v9  ;;  %v316_v18 = vld [vmem:[%s423_s0 + $0x20] sm:$0xff]   ;;  %v317_v24 = vld [vmem:[%s423_s0 + $0x28] sm:$0xff]   ;;  %s347_s11 = smov [#allocation7]  }
   0xc   :  { %v346_v19 = vmov 0.0   ;;  %v318_v25 = vld [vmem:[%s423_s0 + $0x30] sm:$0xff]   ;;  %v319_v27 = vld [vmem:[%s423_s0 + $0x38] sm:$0xff]   ;;  %v267_v29 = vld [vmem:[%s424_s1] ss:$0 sm:$0xff]  ;;  %s253_s12 = sshll.u32 %s347_s11, 4  ;;  %s254_s12 = int_to_ptr.vmem [resolvable:$true] %s253_s12 }
   0xd   :  { %293 = vmatpush3.bf16.msra.mxu0 %v314_v5  ;;  %v37_v14 = vsel %vm36_vm0, %v31_v10, %v10_v1  ;;  %v58_v15 = vsel %vm36_vm0, %v52_v11, %v10_v1  ;;  %v80_v16 = vsel %vm36_vm0, %v74_v12, %v10_v1  ;;  %v102_v17 = vsel %vm36_vm0, %v96_v13, %v10_v1  ;;  %s322_s0 = scalar_lea.vmem %s254_s12, 512  ;;  %p327_p1 = scmp.lt.s32.totalorder %s254_s12, %s254_s12 }
   0xe   :  { %294 = vmatprep.subr.bf16.mxu0 %v315_v7  ;;  %v38_v20 = vpack.c.bf16 %v346_v19, %v37_v14  ;;  %v60_v21 = vpack.c.bf16 %v346_v19, %v58_v15  ;;  %v82_v22 = vpack.c.bf16 %v346_v19, %v80_v16  ;;  %v104_v23 = vpack.c.bf16 %v346_v19, %v102_v17  ;;  %p323_p0 = scmp.ne.s32.totalorder %s254_s12, %s322_s0  ;;  %p328_p2 = scmp.lt.s32.totalorder %s322_s0, %s322_s0 }
  0x10   :  { %40 = vst [vmem:[#allocation9] sm:$0xf] %v38_v20  ;;  %62 = vst [vmem:[#allocation9 + $0x4] sm:$0xf] %v60_v21  ;;  %p329_p3 = por %p328_p2, %p327_p1 }
  0x11   :  { %84 = vst [vmem:[#allocation9 + $0x8] sm:$0xf] %v82_v22  ;;  %106 = vst [vmem:[#allocation9 + $0xc] sm:$0xf] %v104_v23  ;;  %295 = vmatpush3.bf16.msra.mxu0 %v315_v7 }
  0x12   :  { %296 = vmatprep.subr.bf16.mxu0 %v316_v18  ;;  %p330_p4 = pnand %p329_p3, %p323_p0 }
  0x15   :  { %297 = vmatpush3.bf16.msra.mxu0 %v316_v18 }
  0x16   :  { %298 = vmatprep.subr.bf16.mxu0 %v317_v24 }
  0x17   :  { %v320_v26 = vld [vmem:[#allocation9] sm:$0xff]  }
  0x18   :  { %304 = vmatprep.mubr.bf16.mxu0 %v320_v26  ;;  %v321_v28 = vld [vmem:[#allocation9 + $0x8] sm:$0xff]  }
  0x19   :  { %299 = vmatpush3.bf16.msra.mxu0 %v317_v24 }
  0x1a   :  { %300 = vmatprep.subr.bf16.mxu0 %v318_v25 }
  0x1d   :  { %301 = vmatpush3.bf16.msra.mxu0 %v318_v25 }
  0x1e   :  { %302 = vmatprep.subr.bf16.mxu0 %v319_v27 }
  0x21   :  { %303 = vmatpush3.bf16.msra.mxu0 %v319_v27 }
  0x24   :  { %305 = vmatmul.mubr.bf16.vlgmr.msra.gmra.mrb[0].mxu0 %v321_v28 }
  0xf7   :  { %v306_v30 = vpop.f32.mrb[0].mxu0 }
  0xf8   :  { %v238_v31 = vadd.f32 %v306_v30, %v267_v29  ;;  %v229_v32 = vpop.f32.mrb[1].mxu0 }
  0xf9   :  { %v230_v33 = vadd.f32 %v267_v29, %v229_v32  ;;  %v307_v34 = vpop.f32.mrb[2].mxu0 }
  0xfa   :  { %246 = vst [vmem:[#allocation7 + $0x10] sm:$0xff] %v238_v31  ;;  %v241_v35 = vadd.f32 %v307_v34, %v267_v29  ;;  %v232_v36 = vpop.f32.mrb[3].mxu0 }
  0xfb   :  { %244 = vst [vmem:[#allocation7] sm:$0xff] %v230_v33  ;;  %v233_v37 = vadd.f32 %v267_v29, %v232_v36 }
  0xfc   :  { %247 = vst [vmem:[#allocation7 + $0x18] sm:$0xff] %v241_v35 }
  0xfd   :  { %245 = vst [vmem:[#allocation7 + $0x8] sm:$0xff] %v233_v37 }
  0xfe   :  { %333 = shalt.err (!%p330_p4)
}
  0xff   :  { %s334_s14 = scalar_lea.hbm %s427_s4, 512 }
 0x100   :  { %p335_p5 = scmp.ne.s32.totalorder %s427_s4, %s334_s14  ;;  %p338_p6 = scmp.lt.u32.totalorder %s334_s14, %s427_s4 }
 0x102   :  { %p340_p7 = pnand %p338_p6, %p335_p5 }
 0x104   :  { %343 = shalt.err (!%p340_p7)
}
 0x105   :  { %s348_s19 = smov 128   ;;  %s349_s20 = smov 8  }
 0x106   :  { %259 = dma.vmem_to_hbm [thread:$0]  %s254_s12, 512, %s427_s4, [#allocation8], %s348_s19, %s348_s19, %s349_s20  }
 0x107   :  { %344 = dma.done.wait [#allocation8], 512  }
 0x108   :  { %345 = vsyncadd [#allocation8], 4294966784 }
 0x109   :  { %263 = vsyncpa [#allocation8], 1 }

</bundles_post_ra>
